<compile_context>
chip_gen: v6e
topology: v6e:2x2x1
jax: 0.10.0
libtpu: 0.0.40
codegen_flags: <defaults>
</compile_context>

<pallas_src>
import functools

import jax
import jax.numpy as jnp
import numpy as np
from jax.experimental import pallas as pl
from jax.experimental.pallas import tpu as pltpu


def _round_up(x: int, m: int) -> int:
    return (x + m - 1) // m * m


def mlp_kernel(x_ref, w1_ref, b1_ref, w2_ref, b2_ref, o_ref):
    # hidden = relu(x @ W1 + b1): bf16 operands on the MXU, f32 accumulation.
    h = jnp.dot(x_ref[...], w1_ref[...], preferred_element_type=jnp.float32)
    # Bias + ReLU kept in f32 on the VPU (v5e has no bf16 VPU/EUP path).
    h = jnp.maximum(h + b1_ref[0:1, :], 0.0)
    # out = h @ W2 + b2: cast activations back to bf16 for the second MXU pass.
    o = jnp.dot(h.astype(jnp.bfloat16), w2_ref[...],
                preferred_element_type=jnp.float32)
    o_ref[...] = (o + b2_ref[0:1, :]).astype(o_ref.dtype)


def net_forward(x, w1, b1, w2, b2, *, block_b: int = 512):
    """Forward pass of Net: relu(x @ W1 + b1) @ W2 + b2.

    x : (B, F)        float
    w1: (F, H), b1: (H,)   -- weights stored pre-transposed as [in, out]
    w2: (H, O), b2: (O,)
    Returns (B, O) float32.
    """
    B, F = x.shape
    H = w1.shape[1]
    O = w2.shape[1]
    LANE = 128

    H_pad = _round_up(H, LANE)
    O_pad = _round_up(O, LANE)

    # Batch tile: biggest-tile-that-fits policy, capped by the (padded) batch.
    tb = min(block_b, _round_up(B, LANE))
    B_pad = _round_up(B, tb)

    # --- host-side padding / dtype plumbing (pads are zero) -----------------
    x_p = jnp.zeros((B_pad, F), jnp.bfloat16).at[:B, :].set(
        x.astype(jnp.bfloat16))
    w1_p = jnp.zeros((F, H_pad), jnp.bfloat16).at[:, :H].set(
        w1.astype(jnp.bfloat16))
    w2_p = jnp.zeros((H_pad, O_pad), jnp.bfloat16).at[:H, :O].set(
        w2.astype(jnp.bfloat16))
    # Biases as full (8, 128*k) f32 sublane tiles (row 0 used in-kernel).
    b1_p = jnp.zeros((8, H_pad), jnp.float32).at[:, :H].set(
        jnp.broadcast_to(b1.reshape(1, H).astype(jnp.float32), (8, H)))
    b2_p = jnp.zeros((8, O_pad), jnp.float32).at[:, :O].set(
        jnp.broadcast_to(b2.reshape(1, O).astype(jnp.float32), (8, O)))

    vmem = pltpu.MemorySpace.VMEM
    grid = (B_pad // tb,)

    cost = pl.CostEstimate(
        flops=2 * B_pad * (F * H_pad + H_pad * O_pad),
        transcendentals=0,
        bytes_accessed=(x_p.size * 2 + w1_p.size * 2 + w2_p.size * 2
                        + b1_p.size * 4 + b2_p.size * 4 + B_pad * O_pad * 4),
    )

    out_padded = pl.pallas_call(
        mlp_kernel,
        out_shape=jax.ShapeDtypeStruct((B_pad, O_pad), jnp.float32),
        grid=grid,
        in_specs=[
            # Streamed activations: new block each grid step (double-buffered).
            pl.BlockSpec((tb, F), lambda i: (i, 0), memory_space=vmem),
            # Weights / biases: same block index every step -> VMEM-resident.
            pl.BlockSpec((F, H_pad), lambda i: (0, 0), memory_space=vmem),
            pl.BlockSpec((8, H_pad), lambda i: (0, 0), memory_space=vmem),
            pl.BlockSpec((H_pad, O_pad), lambda i: (0, 0), memory_space=vmem),
            pl.BlockSpec((8, O_pad), lambda i: (0, 0), memory_space=vmem),
        ],
        out_specs=pl.BlockSpec((tb, O_pad), lambda i: (i, 0), memory_space=vmem),
        compiler_params=pltpu.CompilerParams(
            dimension_semantics=("parallel",),      # 2 TCs on v7x; free elsewhere
            vmem_limit_bytes=32 * 1024 * 1024,      # safe on v5e/v6e/v7x
        ),
        cost_estimate=cost,
    )(x_p, w1_p, b1_p, w2_p, b2_p)

    return out_padded[:B, :O]


def net_forward_ref(x, w1, b1, w2, b2):
    h = jnp.maximum(x @ w1 + b1.reshape(1, -1), 0.0)
    return h @ w2 + b2.reshape(1, -1)


if __name__ == "__main__":
    # Small shapes consistent with Net(n_feature, n_hidden, n_output).
    # B=256 with block_b=128 exercises a 2-step batch grid with resident weights.
    B, n_feature, n_hidden, n_output = 256, 32, 64, 16

    key = jax.random.PRNGKey(0)
    kx, k1, kb1, k2, kb2 = jax.random.split(key, 5)

    x = jax.random.normal(kx, (B, n_feature), dtype=jnp.float32)

    # PyTorch-Linear-style init: U(-1/sqrt(fan_in), 1/sqrt(fan_in)).
    # Weights stored pre-transposed as [in, out].
    bound1 = 1.0 / np.sqrt(n_feature)
    w1 = jax.random.uniform(k1, (n_feature, n_hidden), jnp.float32, -bound1, bound1)
    b1 = jax.random.uniform(kb1, (n_hidden,), jnp.float32, -bound1, bound1)

    bound2 = 1.0 / np.sqrt(n_hidden)
    w2 = jax.random.uniform(k2, (n_hidden, n_output), jnp.float32, -bound2, bound2)
    b2 = jax.random.uniform(kb2, (n_output,), jnp.float32, -bound2, bound2)

    fwd = jax.jit(functools.partial(net_forward, block_b=128))
    out = jax.block_until_ready(fwd(x, w1, b1, w2, b2))

    ref = net_forward_ref(x, w1, b1, w2, b2)
    # bf16 matmul operands (f32 accumulation) -> compare with loose tolerance.
    np.testing.assert_allclose(np.asarray(out), np.asarray(ref),
                               rtol=2e-2, atol=2e-2)
    assert out.shape == (B, n_output)

    print("KERNEL_OK")
</pallas_src>

<mosaic_0001>
module attributes {stable_mosaic.version = 11 : i64} {
  func.func @mlp_kernel(%arg0: i32, %arg1: memref<128x32xbf16, #tpu.memory_space<vmem>>, %arg2: memref<32x128xbf16, #tpu.memory_space<vmem>>, %arg3: memref<8x128xf32, #tpu.memory_space<vmem>>, %arg4: memref<128x128xbf16, #tpu.memory_space<vmem>>, %arg5: memref<8x128xf32, #tpu.memory_space<vmem>>, %arg6: memref<128x128xf32, #tpu.memory_space<vmem>>) attributes {dimension_semantics = [#tpu.dimension_semantics<parallel>], iteration_bounds = array<i64: 2>, scalar_prefetch = 0 : i64, scratch_operands = 0 : i64, tpu.core_type = #tpu.core_type<tc>, window_params = [{transform_indices = @transform_0, window_bounds = array<i64: 128, 32>}, {pipeline_mode = #tpu.pipeline_mode<synchronous>, transform_indices = @transform_1, window_bounds = array<i64: 32, 128>}, {pipeline_mode = #tpu.pipeline_mode<synchronous>, transform_indices = @transform_2, window_bounds = array<i64: 8, 128>}, {pipeline_mode = #tpu.pipeline_mode<synchronous>, transform_indices = @transform_3, window_bounds = array<i64: 128, 128>}, {pipeline_mode = #tpu.pipeline_mode<synchronous>, transform_indices = @transform_4, window_bounds = array<i64: 8, 128>}, {transform_indices = @transform_5, window_bounds = array<i64: 128, 128>}]} {
    %c0 = arith.constant 0 : index
    %c0_0 = arith.constant 0 : index
    %0 = vector.load %arg1[%c0, %c0_0] : memref<128x32xbf16, #tpu.memory_space<vmem>>, vector<128x32xbf16>
    %c0_1 = arith.constant 0 : index
    %c0_2 = arith.constant 0 : index
    %1 = vector.load %arg2[%c0_1, %c0_2] : memref<32x128xbf16, #tpu.memory_space<vmem>>, vector<32x128xbf16>
    %cst = arith.constant dense<0.000000e+00> : vector<128x128xf32>
    %2 = tpu.matmul %0, %1, %cst {dimension_numbers = #tpu.dot_dimension_numbers<[1], [0], [0], [1], [0, 0, 1, 1], [], []>} : vector<128x32xbf16>, vector<32x128xbf16>, vector<128x128xf32> -> vector<128x128xf32>
    %c0_3 = arith.constant 0 : index
    %c0_4 = arith.constant 0 : index
    %3 = vector.load %arg3[%c0_3, %c0_4] : memref<8x128xf32, #tpu.memory_space<vmem>>, vector<1x128xf32>
    %4 = vector.broadcast %3 : vector<1x128xf32> to vector<128x128xf32>
    %5 = arith.addf %2, %4 : vector<128x128xf32>
    %cst_5 = arith.constant 0.000000e+00 : f32
    %6 = vector.broadcast %cst_5 : f32 to vector<128x128xf32>
    %7 = arith.maximumf %5, %6 : vector<128x128xf32>
    %8 = arith.truncf %7 : vector<128x128xf32> to vector<128x128xbf16>
    %c0_6 = arith.constant 0 : index
    %c0_7 = arith.constant 0 : index
    %9 = vector.load %arg4[%c0_6, %c0_7] : memref<128x128xbf16, #tpu.memory_space<vmem>>, vector<128x128xbf16>
    %cst_8 = arith.constant dense<0.000000e+00> : vector<128x128xf32>
    %10 = tpu.matmul %8, %9, %cst_8 {dimension_numbers = #tpu.dot_dimension_numbers<[1], [0], [0], [1], [0, 0, 1, 1], [], []>} : vector<128x128xbf16>, vector<128x128xbf16>, vector<128x128xf32> -> vector<128x128xf32>
    %c0_9 = arith.constant 0 : index
    %c0_10 = arith.constant 0 : index
    %11 = vector.load %arg5[%c0_9, %c0_10] : memref<8x128xf32, #tpu.memory_space<vmem>>, vector<1x128xf32>
    %12 = vector.broadcast %11 : vector<1x128xf32> to vector<128x128xf32>
    %13 = arith.addf %10, %12 : vector<128x128xf32>
    %c0_11 = arith.constant 0 : index
    %c0_12 = arith.constant 0 : index
    %14 = vector.load %arg6[%c0_11, %c0_12] : memref<128x128xf32, #tpu.memory_space<vmem>>, vector<128x128xf32>
    tpu.vector_store %arg6[%c0_11, %c0_12], %13 {strides = array<i32>} : memref<128x128xf32, #tpu.memory_space<vmem>>, vector<128x128xf32>,
    return
  }
  func.func @transform_0(%arg0: i32) -> (i32, i32) {
    %c0_i32 = arith.constant 0 : i32
    %c0_i32_0 = arith.constant 0 : i32
    return %arg0, %c0_i32 : i32, i32
  }
  func.func @transform_1(%arg0: i32) -> (i32, i32) {
    %c0_i32 = arith.constant 0 : i32
    %c0_i32_0 = arith.constant 0 : i32
    %c0_i32_1 = arith.constant 0 : i32
    return %c0_i32, %c0_i32_0 : i32, i32
  }
  func.func @transform_2(%arg0: i32) -> (i32, i32) {
    %c0_i32 = arith.constant 0 : i32
    %c0_i32_0 = arith.constant 0 : i32
    %c0_i32_1 = arith.constant 0 : i32
    return %c0_i32, %c0_i32_0 : i32, i32
  }
  func.func @transform_3(%arg0: i32) -> (i32, i32) {
    %c0_i32 = arith.constant 0 : i32
    %c0_i32_0 = arith.constant 0 : i32
    %c0_i32_1 = arith.constant 0 : i32
    return %c0_i32, %c0_i32_0 : i32, i32
  }
  func.func @transform_4(%arg0: i32) -> (i32, i32) {
    %c0_i32 = arith.constant 0 : i32
    %c0_i32_0 = arith.constant 0 : i32
    %c0_i32_1 = arith.constant 0 : i32
    return %c0_i32, %c0_i32_0 : i32, i32
  }
  func.func @transform_5(%arg0: i32) -> (i32, i32) {
    %c0_i32 = arith.constant 0 : i32
    %c0_i32_0 = arith.constant 0 : i32
    return %arg0, %c0_i32 : i32, i32
  }
}

</mosaic_0001>

<bundles_post_ra>
// kernel: net_forward.1
= control target key start
LH: loop header
LB: loop body
LE: loop exit
PB: predicated region body
PF: predicated region fallthrough
CT: control target
= control target key end

     0   :  { %s887_s18 = smov 0   ;;  %s980_s0 = inlined_call_operand.vmem [shape: bf16[256,32], index: 0, kind: input, shape index: {}]   ;;  %s981_s1 = inlined_call_operand.vmem [shape: bf16[32,128], index: 1, kind: input, shape index: {}]   ;;  %s982_s2 = inlined_call_operand.vmem [shape: f32[8,128], index: 2, kind: input, shape index: {}]   ;;  %s983_s3 = inlined_call_operand.vmem [shape: bf16[128,128], index: 3, kind: input, shape index: {}]   ;;  %s984_s4 = inlined_call_operand.vmem [shape: f32[8,128], index: 4, kind: input, shape index: {}]   ;;  %s985_s5 = inlined_call_operand.vmem [shape: f32[256,128], index: 5, kind: output, shape index: {}]  }
   0x1 LB: > { %s690_s19 = sadd.s32 4294967295, %s855_s18   ;;  %p694_p0 = scmp.ge.s32.totalorder %s855_s18, 1  ;;  %s855_s18 = sphi %s887_s18, %s15_s18  }
   0x2   : > { %p188_p1 = scmp.lt.s32.totalorder %s855_s18, 3 }
   0x4   : > { %p189_p2 = pnand %p694_p0, %p188_p1 }
   0x5   : > { %s695_s22 = sshll.u32 (!%p189_p2), %s690_s19, 4 }
   0x6   : > { %192 = sbr.rel (%p189_p2) target bundleno = 452 (0x1c4), region = 40  ;;  %p217_p3 = scmp.lt.s32.totalorder (!%p189_p2), %s695_s22, 31 }
   0xb   : > { %v831_v0 = vld [vmem:[%s981_s1 + $0x8] sm:$0xff]   ;;  %v832_v1 = vld [vmem:[%s981_s1] sm:$0xff]   ;;  %v841_v2 = vld [vmem:[%s983_s3 + $0x38] sm:$0xff]   ;;  %s987_s22 = smov (!%p217_p3, %s695_s22), 31  ;;  %vm306_vm0 = vcmask 261120  }
   0xc   : > { %755 = vmatprep.subr.bf16.mxu0 %v831_v0  ;;  %v842_v3 = vld [vmem:[%s983_s3 + $0x30] sm:$0xff]   ;;  %807 = vmatprep.subr.bf16.mxu1 %v841_v2  ;;  %s696_s29 = sshll.u32 %s987_s22, 2  ;;  %v843_v4 = vld [vmem:[%s983_s3 + $0x28] sm:$0xff]   ;;  %v844_v8 = vld [vmem:[%s983_s3 + $0x20] sm:$0xff]   ;;  %s698_s24 = sshll.u32 %s987_s22, 3 }
   0xd   : > { %756 = vmatpush3.bf16.msra.mxu0 %v831_v0  ;;  %815 = vmatpush3.bf16.msra.mxu1 %v841_v2  ;;  %s913_s7 = scalar_lea.vmem %s980_s0, %s696_s29  ;;  %v845_v11 = vld [vmem:[%s983_s3 + $0x18] sm:$0xff]   ;;  %v846_v15 = vld [vmem:[%s983_s3 + $0x10] sm:$0xff]   ;;  %v847_v16 = vld [vmem:[%s983_s3 + $0x8] sm:$0xff]   ;;  %s959_s29 = scalar_lea.vmem %s985_s5, %s698_s24 }
   0xe   : > { %757 = vmatprep.subr.bf16.mxu0 %v832_v1  ;;  %808 = vmatprep.subr.bf16.mxu1 %v842_v3  ;;  %v833_v5 = vld [vmem:[%s913_s7] sm:$0xff]   ;;  %v834_v6 = vld [vmem:[%s913_s7 + $0x8] sm:$0xff]   ;;  %v835_v7 = vld [vmem:[%s913_s7 + $0x10] sm:$0xff]  }
   0xf   : > { %759 = vmatprep.mubr.msk.bf16.mxu0 %vm306_vm0, %v833_v5  ;;  %v836_v9 = vld [vmem:[%s913_s7 + $0x18] sm:$0xff]   ;;  %v837_v10 = vld [vmem:[%s913_s7 + $0x20] sm:$0xff]   ;;  %v838_v12 = vld [vmem:[%s913_s7 + $0x28] sm:$0xff]  }
  0x10   : > { %v839_v13 = vld [vmem:[%s913_s7 + $0x30] sm:$0xff]   ;;  %v840_v14 = vld [vmem:[%s913_s7 + $0x38] sm:$0xff]   ;;  %v848_v17 = vld [vmem:[%s983_s3] sm:$0xff]  }
  0x11   : > { %758 = vmatpush3.bf16.msra.mxu0 %v832_v1  ;;  %816 = vmatpush3.bf16.msra.mxu1 %v842_v3  ;;  %v699_v20 = vld [vmem:[%s982_s2] ss:$0 sm:$0xff] }
  0x12   : > { %775 = vmatprep.subr.bf16.mxu0 %v841_v2  ;;  %809 = vmatprep.subr.bf16.mxu1 %v843_v4 }
  0x14   : > { %760 = vmatmul.mubr.msk.bf16.vlgmr.msra.gmra.mxu0 %vm306_vm0, %v834_v6 }
  0x15   : > { %763 = vmatprep.mubr.msk.bf16.mxu0 %vm306_vm0, %v835_v7  ;;  %776 = vmatpush3.bf16.msra.mxu0 %v841_v2 }
  0x16   : > { %777 = vmatprep.subr.bf16.mxu0 %v842_v3  ;;  %817 = vmatpush3.bf16.msra.mxu1 %v843_v4 }
  0x17   : > { %810 = vmatprep.subr.bf16.mxu1 %v844_v8 }
  0x19   : > { %778 = vmatpush3.bf16.msra.mxu0 %v842_v3 }
  0x1a   : > { %779 = vmatprep.subr.bf16.mxu0 %v843_v4  ;;  %818 = vmatpush3.bf16.msra.mxu1 %v844_v8 }
  0x1b   : > { %811 = vmatprep.subr.bf16.mxu1 %v845_v11 }
  0x1c   : > { %764 = vmatmul.mubr.msk.bf16.gmra.mxu0 %vm306_vm0, %v836_v9 }
  0x1d   : > { %767 = vmatprep.mubr.msk.bf16.mxu0 %vm306_vm0, %v837_v10  ;;  %780 = vmatpush3.bf16.msra.mxu0 %v843_v4 }
  0x1e   : > { %781 = vmatprep.subr.bf16.mxu0 %v844_v8  ;;  %819 = vmatpush3.bf16.msra.mxu1 %v845_v11 }
  0x1f   : > { %812 = vmatprep.subr.bf16.mxu1 %v846_v15 }
  0x21   : > { %782 = vmatpush3.bf16.msra.mxu0 %v844_v8 }
  0x22   : > { %783 = vmatprep.subr.bf16.mxu0 %v845_v11  ;;  %820 = vmatpush3.bf16.msra.mxu1 %v846_v15 }
  0x23   : > { %813 = vmatprep.subr.bf16.mxu1 %v847_v16 }
  0x24   : > { %768 = vmatmul.mubr.msk.bf16.gmra.mxu0 %vm306_vm0, %v838_v12 }
  0x25   : > { %771 = vmatprep.mubr.msk.bf16.mxu0 %vm306_vm0, %v839_v13  ;;  %784 = vmatpush3.bf16.msra.mxu0 %v845_v11  ;;  %v718_v11 = vld [vmem:[%s984_s4] ss:$0 sm:$0xff] }
  0x26   : > { %785 = vmatprep.subr.bf16.mxu0 %v846_v15  ;;  %821 = vmatpush3.bf16.msra.mxu1 %v847_v16 }
  0x27   : > { %814 = vmatprep.subr.bf16.mxu1 %v848_v17 }
  0x29   : > { %786 = vmatpush3.bf16.msra.mxu0 %v846_v15 }
  0x2a   : > { %787 = vmatprep.subr.bf16.mxu0 %v847_v16  ;;  %822 = vmatpush3.bf16.msra.mxu1 %v848_v17 }
  0x2c   : > { %772 = vmatmul.mubr.msk.bf16.gmra.mxu0 %vm306_vm0, %v840_v14 }
  0x2d   : > { %788 = vmatpush3.bf16.msra.mxu0 %v847_v16 }
  0x2e   : > { %789 = vmatprep.subr.bf16.mxu0 %v848_v17 }
  0x31   : > { %790 = vmatpush3.bf16.msra.mxu0 %v848_v17 }
  0xd4   : > { %v761_v18 = vpop.f32.mrf.mxu0 }
  0xd5   : > { %v374_v24 = vadd.f32 %v761_v18, %v699_v20 }
  0xd6   : > { %v365_v19 = vpop.f32.mrf.mxu0 }
  0xd7   : > { %v366_v22 = vadd.f32 %v699_v20, %v365_v19  ;;  %v430_v31 = vmax.f32 %v374_v24, 0.0 }
  0xd8   : > { %v762_v21 = vpop.f32.mrf.mxu0 }
  0xd9   : > { %v377_v23 = vadd.f32 %v762_v21, %v699_v20  ;;  %v428_v29 = vmax.f32 %v366_v22, 0.0 }
  0xda   : > { %v368_v25 = vpop.f32.mrf.mxu0 }
  0xdb   : > { %v369_v26 = vadd.f32 %v699_v20, %v368_v25  ;;  %v431_v27 = vmax.f32 %v377_v23, 0.0 }
  0xdc   : > { %v765_v28 = vpop.f32.mrf.mxu0 }
  0xdd   : > { %v429_v30 = vmax.f32 %v369_v26, 0.0  ;;  %v445_v34 = vpack.c.bf16 %v431_v27, %v430_v31  ;;  %v390_v38 = vadd.f32 %v765_v28, %v699_v20 }
  0xde   : > { %v381_v32 = vpop.f32.mrf.mxu0 }
  0xdf   : > { %v444_v33 = vpack.c.bf16 %v429_v30, %v428_v29  ;;  %v382_v36 = vadd.f32 %v699_v20, %v381_v32  ;;  %v434_v45 = vmax.f32 %v390_v38, 0.0 }
  0xe0   : > { %v766_v35 = vpop.f32.mrf.mxu0 }
  0xe1   : > { %v393_v37 = vadd.f32 %v766_v35, %v699_v20  ;;  %791 = vmatprep.mubr.bf16.mxu0 %v444_v33  ;;  %v432_v43 = vmax.f32 %v382_v36, 0.0 }
  0xe2   : > { %v384_v39 = vpop.f32.mrf.mxu0  ;;  %792 = vmatmul.mubr.bf16.vlgmr.msra.gmra.mxu0 %v445_v34 }
  0xe3   : > { %v385_v40 = vadd.f32 %v699_v20, %v384_v39  ;;  %v435_v41 = vmax.f32 %v393_v37, 0.0 }
  0xe4   : > { %v769_v42 = vpop.f32.mrf.mxu0 }
  0xe5   : > { %v433_v44 = vmax.f32 %v385_v40, 0.0  ;;  %v447_v48 = vpack.c.bf16 %v435_v41, %v434_v45  ;;  %v406_v52 = vadd.f32 %v769_v42, %v699_v20 }
  0xe6   : > { %v397_v46 = vpop.f32.mrf.mxu0 }
  0xe7   : > { %v446_v47 = vpack.c.bf16 %v433_v44, %v432_v43  ;;  %v398_v50 = vadd.f32 %v699_v20, %v397_v46  ;;  %v438_v59 = vmax.f32 %v406_v52, 0.0 }
  0xe8   : > { %v770_v49 = vpop.f32.mrf.mxu0 }
  0xe9   : > { %v409_v51 = vadd.f32 %v770_v49, %v699_v20  ;;  %795 = vmatprep.mubr.bf16.mxu1 %v446_v47  ;;  %v436_v57 = vmax.f32 %v398_v50, 0.0 }
  0xea   : > { %v400_v53 = vpop.f32.mrf.mxu0  ;;  %796 = vmatmul.mubr.bf16.vlgmr.msra.gmra.mxu1 %v447_v48 }
  0xeb   : > { %v401_v54 = vadd.f32 %v699_v20, %v400_v53  ;;  %v439_v55 = vmax.f32 %v409_v51, 0.0 }
  0xec   : > { %v773_v56 = vpop.f32.mrf.mxu0 }
  0xed   : > { %v437_v58 = vmax.f32 %v401_v54, 0.0  ;;  %v449_v62 = vpack.c.bf16 %v439_v55, %v438_v59  ;;  %v422_v2 = vadd.f32 %v773_v56, %v699_v20 }
  0xee   : > { %v413_v60 = vpop.f32.mrf.mxu0 }
  0xef   : > { %v448_v61 = vpack.c.bf16 %v437_v58, %v436_v57  ;;  %v414_v0 = vadd.f32 %v699_v20, %v413_v60  ;;  %v442_v8 = vmax.f32 %v422_v2, 0.0 }
  0xf0   : > { %v774_v63 = vpop.f32.mrf.mxu0 }
  0xf1   : > { %v425_v1 = vadd.f32 %v774_v63, %v699_v20  ;;  %799 = vmatprep.mubr.bf16.mxu1 %v448_v61  ;;  %v440_v6 = vmax.f32 %v414_v0, 0.0 }
  0xf2   : > { %v416_v3 = vpop.f32.mrf.mxu0  ;;  %800 = vmatmul.mubr.bf16.gmra.mxu1 %v449_v62 }
  0xf3   : > { %v417_v4 = vadd.f32 %v699_v20, %v416_v3  ;;  %v443_v5 = vmax.f32 %v425_v1, 0.0 }
  0xf5   : > { %v441_v7 = vmax.f32 %v417_v4, 0.0  ;;  %v451_v10 = vpack.c.bf16 %v443_v5, %v442_v8 }
  0xf7   : > { %v450_v9 = vpack.c.bf16 %v441_v7, %v440_v6 }
  0xf9   : > { %803 = vmatprep.mubr.bf16.mxu1 %v450_v9 }
  0xfa   : > { %804 = vmatmul.mubr.bf16.gmra.mxu1 %v451_v10 }
 0x1a2   : > { %v793_v12 = vpop.f32.mrf.mxu0 }
 0x1a3   : > { %v564_v13 = vadd.f32 %v793_v12, %v718_v11 }
 0x1a4   : > { %v555_v14 = vpop.f32.mrf.mxu0 }
 0x1a5   : > { %620 = vst [vmem:[%s959_s29 + $0x10] sm:$0xff] %v564_v13  ;;  %v556_v15 = vadd.f32 %v718_v11, %v555_v14 }
 0x1a6   : > { %v794_v16 = vpop.f32.mrf.mxu0 }
 0x1a7   : > { %618 = vst [vmem:[%s959_s29] sm:$0xff] %v556_v15  ;;  %v567_v17 = vadd.f32 %v794_v16, %v718_v11 }
 0x1a8   : > { %v558_v18 = vpop.f32.mrf.mxu0 }
 0x1a9   : > { %621 = vst [vmem:[%s959_s29 + $0x18] sm:$0xff] %v567_v17  ;;  %v559_v19 = vadd.f32 %v718_v11, %v558_v18 }
 0x1aa   : > { %v797_v20 = vpop.f32.mrf.mxu1 }
 0x1ab   : > { %619 = vst [vmem:[%s959_s29 + $0x8] sm:$0xff] %v559_v19  ;;  %v580_v21 = vadd.f32 %v797_v20, %v718_v11 }
 0x1ac   : > { %v571_v22 = vpop.f32.mrf.mxu1 }
 0x1ad   : > { %624 = vst [vmem:[%s959_s29 + $0x30] sm:$0xff] %v580_v21  ;;  %v572_v23 = vadd.f32 %v718_v11, %v571_v22 }
 0x1ae   : > { %v798_v24 = vpop.f32.mrf.mxu1 }
 0x1af   : > { %622 = vst [vmem:[%s959_s29 + $0x20] sm:$0xff] %v572_v23  ;;  %v583_v25 = vadd.f32 %v798_v24, %v718_v11 }
 0x1b0   : > { %v574_v26 = vpop.f32.mrf.mxu1 }
 0x1b1   : > { %625 = vst [vmem:[%s959_s29 + $0x38] sm:$0xff] %v583_v25  ;;  %v575_v27 = vadd.f32 %v718_v11, %v574_v26 }
 0x1b2   : > { %v801_v28 = vpop.f32.mrf.mxu1 }
 0x1b3   : > { %623 = vst [vmem:[%s959_s29 + $0x28] sm:$0xff] %v575_v27  ;;  %v596_v29 = vadd.f32 %v801_v28, %v718_v11 }
 0x1b4   : > { %v587_v30 = vpop.f32.mrf.mxu1 }
 0x1b5   : > { %628 = vst [vmem:[%s959_s29 + $0x50] sm:$0xff] %v596_v29  ;;  %v588_v31 = vadd.f32 %v718_v11, %v587_v30 }
 0x1b6   : > { %v802_v32 = vpop.f32.mrf.mxu1 }
 0x1b7   : > { %626 = vst [vmem:[%s959_s29 + $0x40] sm:$0xff] %v588_v31  ;;  %v599_v33 = vadd.f32 %v802_v32, %v718_v11 }
 0x1b8   : > { %v590_v34 = vpop.f32.mrf.mxu1 }
 0x1b9   : > { %629 = vst [vmem:[%s959_s29 + $0x58] sm:$0xff] %v599_v33  ;;  %v591_v35 = vadd.f32 %v718_v11, %v590_v34 }
 0x1ba   : > { %v805_v36 = vpop.f32.mrf.mxu1 }
 0x1bb   : > { %627 = vst [vmem:[%s959_s29 + $0x48] sm:$0xff] %v591_v35  ;;  %v612_v37 = vadd.f32 %v805_v36, %v718_v11 }
 0x1bc   : > { %v603_v38 = vpop.f32.mrf.mxu1 }
 0x1bd   : > { %632 = vst [vmem:[%s959_s29 + $0x70] sm:$0xff] %v612_v37  ;;  %v604_v39 = vadd.f32 %v718_v11, %v603_v38 }
 0x1be   : > { %v806_v40 = vpop.f32.mrf.mxu1 }
 0x1bf   : > { %630 = vst [vmem:[%s959_s29 + $0x60] sm:$0xff] %v604_v39  ;;  %v615_v41 = vadd.f32 %v806_v40, %v718_v11 }
 0x1c0   : > { %v606_v42 = vpop.f32.mrf.mxu1 }
 0x1c1   : > { %633 = vst [vmem:[%s959_s29 + $0x78] sm:$0xff] %v615_v41  ;;  %v607_v43 = vadd.f32 %v718_v11, %v606_v42 }
 0x1c3   : > { %631 = vst [vmem:[%s959_s29 + $0x68] sm:$0xff] %v607_v43 }
 0x1c4 PF: > { %s15_s18 = sadd.s32 1, %s855_s18  }
 0x1c5   : > { %p12_p4 = scmp.ge.s32.totalorder %s15_s18, 4  }
 0x1c7   :  { %14 = sbr.rel (!%p12_p4) target bundleno = 1 (0x1), region = 70 }

</bundles_post_ra>
